<compile_context>
chip_gen: v7x
topology: tpu7x:2x2x1
jax: 0.10.0
libtpu: 0.0.40
codegen_flags: <defaults>
</compile_context>

<pallas_src>
import jax
import jax.numpy as jnp
from jax.experimental import pallas as pl
from jax.experimental.pallas import tpu as pltpu


def classifier_kernel(adj_ref, xk_ref, xm_ref, w1_ref, b1_ref, w2_ref,
                      eps_ref, b2_ref, out_ref, acc_ref):
    k = pl.program_id(1)          # reduction-tile index ("arbitrary", last)
    nk = pl.num_programs(1)

    # --- init accumulator with the (1 + eps) * self term (f32 row slice) ----
    @pl.when(k == 0)
    def _init():
        acc_ref[...] = (1.0 + eps_ref[0]) * xm_ref[...]

    # --- streamed int8 adjacency tile -> bf16 (lossless for 0/1) ------------
    # native bf16 x bf16 MXU matmul, f32 accumulation.
    acc_ref[...] += jnp.dot(adj_ref[...].astype(jnp.bfloat16), xk_ref[...],
                            preferred_element_type=jnp.float32)

    # --- epilogue: GIN MLP + predict head, lane-dense store -----------------
    @pl.when(k == nk - 1)
    def _epilogue():
        pooled = acc_ref[...]                                        # (tm, D)
        h1 = jnp.dot(pooled, w1_ref[...],
                     preferred_element_type=jnp.float32)             # (tm, H)
        h1 = jnp.maximum(h1 + b1_ref[...], 0.0)
        # 1-wide output matmul -> VPU multiply + XLU lane reduce (MXU-free).
        logits = jnp.sum(h1 * w2_ref[...], axis=-1) + b2_ref[0]      # (tm,)
        out_ref[0, :] = jax.nn.sigmoid(logits)


def _default_vmem_limit_bytes():
    # ~75% of physical VMEM: ~96 MiB on v5e/v6e (128 MiB), ~48 MiB on v7x (64).
    cap = 64 * 1024 * 1024
    try:
        info = pltpu.get_tpu_info()
        cap = getattr(info, "vmem_capacity_bytes", cap) or cap
    except Exception:
        pass
    return int(cap * 3 // 4)


def classifier_forward(adj, x, params, *, tm=None, tk=None):
    N, D = x.shape
    H = params["w1"].shape[1]

    # Tile defaults: multi-MiB adjacency steps (amortize per-step overhead),
    # and keep at least 2 row tiles so v7x's two TensorCores split the
    # "parallel" axis. Pass explicit tm/tk for non-power-of-two N.
    if tm is None:
        tm = min(1024, N)
        if N // tm < 2 and N % 2 == 0 and (N // 2) % 128 == 0:
            tm = N // 2
    if tk is None:
        tk = min(4096, N)
    assert N % tm == 0 and N % tk == 0, "N must be divisible by tile sizes"

    adj_i8 = adj.astype(jnp.int8)                # 0/1 -> lossless, 1 B/elem HBM stream
    x_bf16 = x.astype(jnp.bfloat16)              # bf16 MXU operand (K-slices)
    b1 = params["b1"].reshape(1, H)              # lane-major bias
    w2 = params["w2"].reshape(1, H)              # lane-major row for VPU dot
    eps = params["eps"].reshape(1)
    b2 = params["b2"].reshape(1)

    grid = (N // tm, N // tk)

    def resident(shape):  # fully VMEM-resident, fetched once
        return pl.BlockSpec(shape, lambda i, k: (0, 0))

    smem = pl.BlockSpec(memory_space=pltpu.MemorySpace.SMEM)

    cost = pl.CostEstimate(
        flops=2 * N * N * D + 2 * N * D * H + 2 * N * H,
        transcendentals=N,
        bytes_accessed=(N * N * 1                    # int8 adjacency stream
                        + (N // tm) * N * D * 2      # re-streamed bf16 x K-slices
                        + N * D * 4                  # f32 x row slices
                        + (D * H + 2 * H + 2) * 4    # weights / biases
                        + N * 4),                    # output row
    )

    out_row = pl.pallas_call(
        classifier_kernel,
        out_shape=jax.ShapeDtypeStruct((1, N), jnp.float32),
        grid=grid,
        in_specs=[
            pl.BlockSpec((tm, tk), lambda i, k: (i, k)),   # adj: streamed int8 tiles
            pl.BlockSpec((tk, D), lambda i, k: (k, 0)),    # x bf16: K-slice stream
            pl.BlockSpec((tm, D), lambda i, k: (i, 0)),    # x f32: row slice (self term)
            resident((D, H)),                              # w1
            resident((1, H)),                              # b1
            resident((1, H)),                              # w2 row
            smem,                                          # eps scalar
            smem,                                          # b2 scalar
        ],
        out_specs=pl.BlockSpec((1, tm), lambda i, k: (0, i)),  # lane-dense out
        scratch_shapes=[pltpu.VMEM((tm, D), jnp.float32)],
        compiler_params=pltpu.CompilerParams(
            dimension_semantics=("parallel", "arbitrary"),
            vmem_limit_bytes=_default_vmem_limit_bytes(),
        ),
        cost_estimate=cost,
    )(adj_i8, x_bf16, x, params["w1"], b1, w2, eps, b2)

    return out_row.reshape(N, 1)


def init_params(key, input_dim, hidden_dim):
    k1, k2, k3, k4 = jax.random.split(key, 4)
    return {
        "eps": jnp.zeros((1,), jnp.float32),  # GIN eps (GIN-0 style)
        "w1": jax.random.normal(k1, (input_dim, hidden_dim), jnp.float32) * 0.1,
        "b1": jax.random.normal(k2, (hidden_dim,), jnp.float32) * 0.01,
        "w2": jax.random.normal(k3, (hidden_dim, 1), jnp.float32) * 0.1,
        "b2": jax.random.normal(k4, (1,), jnp.float32) * 0.01,
    }


def reference_forward(adj, x, params):
    pooled = adj @ x + (1.0 + params["eps"][0]) * x
    h1 = jnp.maximum(pooled @ params["w1"] + params["b1"], 0.0)
    return jax.nn.sigmoid(h1 @ params["w2"] + params["b2"])


if __name__ == "__main__":
    N, input_dim, hidden_dim = 256, 16, 32
    key = jax.random.PRNGKey(0)
    k_adj, k_x, k_p = jax.random.split(key, 3)

    # deterministic small graph: symmetric 0/1 adjacency, no self loops
    a = (jax.random.uniform(k_adj, (N, N)) < 0.05).astype(jnp.float32)
    adj = jnp.maximum(a, a.T) * (1.0 - jnp.eye(N, dtype=jnp.float32))
    x = jax.random.normal(k_x, (N, input_dim), jnp.float32)

    params = init_params(k_p, input_dim, hidden_dim)

    # tm=tk=128 -> 2x2 grid: exercises the K-reduction accumulator + epilogue.
    out = classifier_forward(adj, x, params, tm=128, tk=128)
    out = jax.block_until_ready(out)

    ref = reference_forward(adj, x, params)
    assert out.shape == (N, 1)
    # tolerance covers bf16 rounding of x on the MXU path plus f32
    # re-association from K-chunked accumulation (adjacency itself is exact).
    assert jnp.allclose(out, ref, atol=1e-2, rtol=1e-2)
    print("KERNEL_OK")
</pallas_src>

<mosaic_0001>
module attributes {stable_mosaic.version = 11 : i64} {
  func.func @classifier_kernel(%arg0: i32, %arg1: i32, %arg2: memref<128x128xi8, #tpu.memory_space<vmem>>, %arg3: memref<128x16xbf16, #tpu.memory_space<vmem>>, %arg4: memref<128x16xf32, #tpu.memory_space<vmem>>, %arg5: memref<16x32xf32, #tpu.memory_space<vmem>>, %arg6: memref<1x32xf32, #tpu.memory_space<vmem>>, %arg7: memref<1x32xf32, #tpu.memory_space<vmem>>, %arg8: memref<1xf32, #tpu.memory_space<smem>>, %arg9: memref<1xf32, #tpu.memory_space<smem>>, %arg10: memref<1x128xf32, #tpu.memory_space<vmem>>, %arg11: memref<128x16xf32, #tpu.memory_space<vmem>>) attributes {dimension_semantics = [#tpu.dimension_semantics<parallel>, #tpu.dimension_semantics<arbitrary>], iteration_bounds = array<i64: 2, 2>, scalar_prefetch = 0 : i64, scratch_operands = 1 : i64, tpu.core_type = #tpu.core_type<tc>, window_params = [{transform_indices = @transform_0, window_bounds = array<i64: 128, 128>}, {transform_indices = @transform_1, window_bounds = array<i64: 128, 16>}, {transform_indices = @transform_2, window_bounds = array<i64: 128, 16>}, {pipeline_mode = #tpu.pipeline_mode<synchronous>, transform_indices = @transform_3, window_bounds = array<i64: 16, 32>}, {pipeline_mode = #tpu.pipeline_mode<synchronous>, transform_indices = @transform_4, window_bounds = array<i64: 1, 32>}, {pipeline_mode = #tpu.pipeline_mode<synchronous>, transform_indices = @transform_5, window_bounds = array<i64: 1, 32>}, {transform_indices = @transform_6, window_bounds = array<i64: 1>}, {transform_indices = @transform_7, window_bounds = array<i64: 1>}, {transform_indices = @transform_8, window_bounds = array<i64: 1, 128>}]} {
    %c0_i32 = arith.constant 0 : i32
    %0 = arith.cmpi eq, %arg1, %c0_i32 : i32
    %1 = arith.extui %0 : i1 to i32
    %c0_i32_0 = arith.constant 0 : i32
    %2 = arith.cmpi ne, %1, %c0_i32_0 : i32
    scf.if %2 {
      %c0_9 = arith.constant 0 : index
      %13 = memref.load %arg8[%c0_9] : memref<1xf32, #tpu.memory_space<smem>>
      %cst_10 = arith.constant 1.000000e+00 : f32
      %14 = arith.addf %cst_10, %13 : f32
      %c0_11 = arith.constant 0 : index
      %c0_12 = arith.constant 0 : index
      %15 = vector.load %arg4[%c0_11, %c0_12] : memref<128x16xf32, #tpu.memory_space<vmem>>, vector<128x16xf32>
      %16 = vector.broadcast %14 : f32 to vector<128x16xf32>
      %17 = arith.mulf %16, %15 : vector<128x16xf32>
      %c0_13 = arith.constant 0 : index
      %c0_14 = arith.constant 0 : index
      %18 = vector.load %arg11[%c0_13, %c0_14] : memref<128x16xf32, #tpu.memory_space<vmem>>, vector<128x16xf32>
      tpu.vector_store %arg11[%c0_13, %c0_14], %17 {strides = array<i32>} : memref<128x16xf32, #tpu.memory_space<vmem>>, vector<128x16xf32>,
    } else {
    }
    %c0 = arith.constant 0 : index
    %c0_1 = arith.constant 0 : index
    %3 = vector.load %arg11[%c0, %c0_1] : memref<128x16xf32, #tpu.memory_space<vmem>>, vector<128x16xf32>
    %c0_2 = arith.constant 0 : index
    %c0_3 = arith.constant 0 : index
    %4 = vector.load %arg2[%c0_2, %c0_3] : memref<128x128xi8, #tpu.memory_space<vmem>>, vector<128x128xi8>
    %5 = arith.sitofp %4 : vector<128x128xi8> to vector<128x128xbf16>
    %c0_4 = arith.constant 0 : index
    %c0_5 = arith.constant 0 : index
    %6 = vector.load %arg3[%c0_4, %c0_5] : memref<128x16xbf16, #tpu.memory_space<vmem>>, vector<128x16xbf16>
    %cst = arith.constant dense<0.000000e+00> : vector<128x16xf32>
    %7 = tpu.matmul %5, %6, %cst {dimension_numbers = #tpu.dot_dimension_numbers<[1], [0], [0], [1], [0, 0, 1, 1], [], []>} : vector<128x128xbf16>, vector<128x16xbf16>, vector<128x16xf32> -> vector<128x16xf32>
    %8 = arith.addf %3, %7 : vector<128x16xf32>
    %c0_6 = arith.constant 0 : index
    %c0_7 = arith.constant 0 : index
    %9 = vector.load %arg11[%c0_6, %c0_7] : memref<128x16xf32, #tpu.memory_space<vmem>>, vector<128x16xf32>
    tpu.vector_store %arg11[%c0_6, %c0_7], %8 {strides = array<i32>} : memref<128x16xf32, #tpu.memory_space<vmem>>, vector<128x16xf32>,
    %c1_i32 = arith.constant 1 : i32
    %10 = arith.cmpi eq, %arg1, %c1_i32 : i32
    %11 = arith.extui %10 : i1 to i32
    %c0_i32_8 = arith.constant 0 : i32
    %12 = arith.cmpi ne, %11, %c0_i32_8 : i32
    scf.if %12 {
      %c0_9 = arith.constant 0 : index
      %c0_10 = arith.constant 0 : index
      %13 = vector.load %arg11[%c0_9, %c0_10] : memref<128x16xf32, #tpu.memory_space<vmem>>, vector<128x16xf32>
      %c0_11 = arith.constant 0 : index
      %c0_12 = arith.constant 0 : index
      %14 = vector.load %arg5[%c0_11, %c0_12] : memref<16x32xf32, #tpu.memory_space<vmem>>, vector<16x32xf32>
      %cst_13 = arith.constant dense<0.000000e+00> : vector<128x32xf32>
      %15 = tpu.matmul %13, %14, %cst_13 {dimension_numbers = #tpu.dot_dimension_numbers<[1], [0], [0], [1], [0, 0, 1, 1], [], []>} : vector<128x16xf32>, vector<16x32xf32>, vector<128x32xf32> -> vector<128x32xf32>
      %c0_14 = arith.constant 0 : index
      %c0_15 = arith.constant 0 : index
      %16 = vector.load %arg6[%c0_14, %c0_15] : memref<1x32xf32, #tpu.memory_space<vmem>>, vector<1x32xf32>
      %17 = vector.broadcast %16 : vector<1x32xf32> to vector<128x32xf32>
      %18 = arith.addf %15, %17 : vector<128x32xf32>
      %cst_16 = arith.constant 0.000000e+00 : f32
      %19 = vector.broadcast %cst_16 : f32 to vector<128x32xf32>
      %20 = arith.maximumf %18, %19 : vector<128x32xf32>
      %c0_17 = arith.constant 0 : index
      %c0_18 = arith.constant 0 : index
      %21 = vector.load %arg7[%c0_17, %c0_18] : memref<1x32xf32, #tpu.memory_space<vmem>>, vector<1x32xf32>
      %22 = vector.broadcast %21 : vector<1x32xf32> to vector<128x32xf32>
      %23 = arith.mulf %20, %22 : vector<128x32xf32>
      %cst_19 = arith.constant dense<0.000000e+00> : vector<128xf32>
      %24 = vector.multi_reduction <add>, %23, %cst_19 [1] : vector<128x32xf32> to vector<128xf32>
      %c0_20 = arith.constant 0 : index
      %25 = memref.load %arg9[%c0_20] : memref<1xf32, #tpu.memory_space<smem>>
      %26 = vector.broadcast %25 : f32 to vector<128xf32>
      %27 = arith.addf %24, %26 : vector<128xf32>
      %28 = arith.negf %27 : vector<128xf32>
      %29 = math.exp %28 : vector<128xf32>
      %cst_21 = arith.constant 1.000000e+00 : f32
      %30 = vector.broadcast %cst_21 : f32 to vector<128xf32>
      %31 = arith.addf %30, %29 : vector<128xf32>
      %32 = arith.divf %30, %31 : vector<128xf32>
      %c0_22 = arith.constant 0 : index
      %c0_23 = arith.constant 0 : index
      %33 = vector.load %arg10[%c0_22, %c0_23] : memref<1x128xf32, #tpu.memory_space<vmem>>, vector<1x128xf32>
      %34 = vector.shape_cast %33 : vector<1x128xf32> to vector<128xf32>
      %35 = vector.shape_cast %32 : vector<128xf32> to vector<1x128xf32>
      tpu.vector_store %arg10[%c0_22, %c0_23], %35 {strides = array<i32>} : memref<1x128xf32, #tpu.memory_space<vmem>>, vector<1x128xf32>,
    } else {
    }
    return
  }
  func.func @transform_0(%arg0: i32, %arg1: i32) -> (i32, i32) {
    %c0_i32 = arith.constant 0 : i32
    return %arg0, %arg1 : i32, i32
  }
  func.func @transform_1(%arg0: i32, %arg1: i32) -> (i32, i32) {
    %c0_i32 = arith.constant 0 : i32
    %c0_i32_0 = arith.constant 0 : i32
    return %arg1, %c0_i32 : i32, i32
  }
  func.func @transform_2(%arg0: i32, %arg1: i32) -> (i32, i32) {
    %c0_i32 = arith.constant 0 : i32
    %c0_i32_0 = arith.constant 0 : i32
    return %arg0, %c0_i32 : i32, i32
  }
  func.func @transform_3(%arg0: i32, %arg1: i32) -> (i32, i32) {
    %c0_i32 = arith.constant 0 : i32
    %c0_i32_0 = arith.constant 0 : i32
    %c0_i32_1 = arith.constant 0 : i32
    return %c0_i32, %c0_i32_0 : i32, i32
  }
  func.func @transform_4(%arg0: i32, %arg1: i32) -> (i32, i32) {
    %c0_i32 = arith.constant 0 : i32
    %c0_i32_0 = arith.constant 0 : i32
    %c0_i32_1 = arith.constant 0 : i32
    return %c0_i32, %c0_i32_0 : i32, i32
  }
  func.func @transform_5(%arg0: i32, %arg1: i32) -> (i32, i32) {
    %c0_i32 = arith.constant 0 : i32
    %c0_i32_0 = arith.constant 0 : i32
    %c0_i32_1 = arith.constant 0 : i32
    return %c0_i32, %c0_i32_0 : i32, i32
  }
  func.func @transform_6(%arg0: i32, %arg1: i32) -> i32 {
    %c0_i32 = arith.constant 0 : i32
    %c0_i32_0 = arith.constant 0 : i32
    return %c0_i32 : i32
  }
  func.func @transform_7(%arg0: i32, %arg1: i32) -> i32 {
    %c0_i32 = arith.constant 0 : i32
    %c0_i32_0 = arith.constant 0 : i32
    return %c0_i32 : i32
  }
  func.func @transform_8(%arg0: i32, %arg1: i32) -> (i32, i32) {
    %c0_i32 = arith.constant 0 : i32
    %c0_i32_0 = arith.constant 0 : i32
    return %c0_i32, %arg0 : i32, i32
  }
}

</mosaic_0001>

<bundles_post_ra>
// kernel: tpu_custom_call.1
= control target key start
LH: loop header
LB: loop body
LE: loop exit
PB: predicated region body
PF: predicated region fallthrough
CT: control target
= control target key end

     0   :  { %s2225_s0 = inlined_call_operand.vmem [shape: s8[256,256], index: 0, kind: input, shape index: {}]   ;;  %s2226_s1 = inlined_call_operand.vmem [shape: bf16[256,16], index: 1, kind: input, shape index: {}]   ;;  %s2227_s2 = inlined_call_operand.vmem [shape: f32[256,16], index: 2, kind: input, shape index: {}]   ;;  %s2228_s3 = inlined_call_operand.vmem [shape: f32[16,32], index: 3, kind: input, shape index: {}]   ;;  %s2229_s4 = inlined_call_operand.vmem [shape: f32[1,32], index: 4, kind: input, shape index: {}]   ;;  %s2230_s5 = inlined_call_operand.vmem [shape: f32[1,32], index: 5, kind: input, shape index: {}]   ;;  %s2231_s6 = inlined_call_operand.<no memory space> [shape: f32[1], index: 6, kind: input, shape index: {}]   ;;  %s2232_s7 = inlined_call_operand.<no memory space> [shape: f32[1], index: 7, kind: input, shape index: {}]   ;;  %s2233_s8 = inlined_call_operand.hbm [shape: f32[1,256], index: 8, kind: output, shape index: {}]  }
   0x1   :  { %2238 = sst [smem:[#allocation14_spill]] %s2225_s0 }
   0x2   :  { %13 = sst [smem:[#allocation3]] %s2231_s6 }
   0x3   :  { %14 = sst [smem:[#allocation4]] %s2232_s7 }
   0x4   :  { %15 = vsyncpa [#allocation7], 0 }
   0x5   :  { %17 = vsyncpa [#allocation7 + $0x1], 0  ;;  %s1857_s9 = smov 0   ;;  %s1859_s10 = smov 0  }
   0x6   :  { %s1861_s11 = smov 0   ;;  %s1863_s12 = smov 0  }
   0x7   :  { %s1865_s13 = smov 0   ;;  %s1867_s14 = smov 0  }
   0x8   :  { %s1869_s15 = smov 0   ;;  %s1871_s6 = smov 0  }
   0x9   :  { %s1873_s16 = smov 0   ;;  %s1875_s7 = smov 0  }
   0xa LB: > { %2239 = sst [smem:[#allocation9_spill]] %s1795_s6  ;;  %s1356_s17 = sadd.s32 4294967295, %s1803_s7   ;;  %s1803_s7 = sphi %s1875_s7, %s23_s7   ;;  %s1799_s16 = sphi %s1873_s16, %s2254_s16   ;;  %s1795_s6 = sphi %s1871_s6, %s2253_s6   ;;  %s1791_s15 = sphi %s1869_s15, %s2252_s15   ;;  %s1787_s14 = sphi %s1867_s14, %s2251_s14   ;;  %s1783_s13 = sphi %s1865_s13, %s2259_s13   ;;  %s1779_s12 = sphi %s1863_s12, %s2258_s12   ;;  %s1775_s11 = sphi %s1861_s11, %s2257_s11   ;;  %s1771_s10 = sphi %s1859_s10, %s2256_s10   ;;  %s1767_s9 = sphi %s1857_s9, %s2255_s9  }
   0xb   : > { %2240 = sst [smem:[#allocation10_spill]] %s1799_s16  ;;  %s1357_s18 = sadd.s32 4294967294, %s1803_s7  }
   0xc   : > { %s32_s19 = sadd.s32 1, %s1795_s6  ;;  %s35_s20 = sadd.s32 1, %s1799_s16 }
   0xd   : > { %p33_p0 = scmp.ge.s32.totalorder %s32_s19, 2  ;;  %s44_s21 = sadd.s32 1, %s1783_s13 }
   0xe   : > { %p51_p1 = scmp.ne.s32.totalorder %s1783_s13, %s1779_s12  ;;  %p52_p2 = scmp.eq.s32.totalorder %s1803_s7, 0 }
   0xf   : > { %s2261_s19 = smov (%p33_p0, %s32_s19), 0  ;;  %s2263_s20 = smov (!%p33_p0, %s35_s20), %s1799_s16 }
  0x10   : > { %2241 = sst [smem:[#allocation11_spill]] %s2261_s19  ;;  %s40_s22 = ssub.s32 %s1795_s6, %s2261_s19 }
  0x11   : > { %p1920_p3 = por %p52_p2, %p51_p1  ;;  %p37_p4 = scmp.ge.s32.totalorder %s2263_s20, 2 }
  0x12   : > { %s227_s24 = sadd.s32 1, %s1775_s11  ;;  %p237_p5 = scmp.ne.s32.totalorder %s1775_s11, %s1771_s10 }
  0x13   : > { %p238_p6 = scmp.eq.s32.totalorder %s1356_s17, 3  ;;  %s2265_s20 = smov (%p37_p4, %s2263_s20), 0 }
  0x14   : > { %2243 = sst [smem:[#allocation12_spill]] %s2265_s20  ;;  %p243_p8 = scmp.ne.s32.totalorder %s1771_s10, %s1767_s9 }
  0x15   : > { %p1929_p7 = por %p238_p6, %p237_p5  ;;  %s39_s26 = ssub.s32 %s1799_s16, %s2265_s20 }
  0x16   : > { %p244_p9 = scmp.eq.s32.totalorder %s1357_s18, 3  ;;  %s41_s27 = sor.u32 %s40_s22, %s39_s26 }
  0x17   : > { %p225_p10 = scmp.eq.s32.totalorder %s39_s26, 0  ;;  %p42_p11 = scmp.eq.s32.totalorder %s41_s27, 0 }
  0x18   : > { %p1937_p12 = por %p244_p9, %p243_p8  ;;  %p1359_p13 = scmp.ge.s32.totalorder %s1803_s7, 4 }
  0x19   : > { %s1942_s29 = scalar_select %p225_p10, %s1775_s11, %s227_s24  }
  0x1a   : > { %s1945_s30 = scalar_select %p42_p11, %s1783_s13, %s44_s21  }
  0x1b   : > { %275 = sbr.rel (%p1359_p13) target bundleno = 46 (0x2e), region = 36 }
  0x1c   : > { %2246 = sst [smem:[#allocation13_spill]] %s1945_s30 }
  0x22   : > { %278 = sbr.rel (!%p1920_p3) target bundleno = 46 (0x2e), region = 40  ;;  %s280_s17 = sand.u32 (%p1920_p3), 1, %s1783_s13  }
  0x23   : > { %s1417_s18 = sshll.u32 (%p1920_p3), %s1799_s16, 3  ;;  %s1360_s22 = sshll.u32 (%p1920_p3), %s280_s17, 5 }
  0x24   : > { %s285_s26 = sadd.s32 (%p1920_p3), %s1795_s6, %s1417_s18  ;;  %s2247_s0 = sld [smem:[#allocation14_spill]] (%p1920_p3) }
  0x25   : > { %s1363_s27 = sshll.u32 (%p1920_p3), %s285_s26, 3  ;;  %s282_s21 = scalar_lea.vmem (%p1920_p3), [#allocation5], %s1360_s22 }
  0x2a   : > { %s287_s24 = scalar_lea.vmem %s2247_s0, %s1363_s27 }
  0x2b   : > { %v321_v0 = vld [vmem:[%s287_s24] sm:$0xff]  ;;  %v323_v1 = vld [vmem:[%s287_s24 + $0x10] sm:$0xff] }
  0x2c   : > { %v325_v2 = vld [vmem:[%s287_s24 + $0x20] sm:$0xff]  ;;  %322 = vst [vmem:[%s282_s21] sm:$0xff] %v321_v0  ;;  %324 = vst [vmem:[%s282_s21 + $0x8] sm:$0xff] %v323_v1  ;;  %v327_v3 = vld [vmem:[%s287_s24 + $0x30] sm:$0xff] }
  0x2d   : > { %326 = vst [vmem:[%s282_s21 + $0x10] sm:$0xff] %v325_v2  ;;  %328 = vst [vmem:[%s282_s21 + $0x18] sm:$0xff] %v327_v3 }
  0x2e PF: > { %p1364_p0 = scmp.ge.s32.totalorder %s1803_s7, 1  ;;  %p351_p1 = scmp.lt.s32.totalorder %s1803_s7, 5 }
  0x30   : > { %p352_p2 = pnand %p1364_p0, %p351_p1 }
  0x31   : > { %s358_s19 = sand.u32 (!%p352_p2), 1, %s1779_s12   ;;  %s1366_s17 = sshll.u32 (!%p352_p2), %s1787_s14, 4 }
  0x32   : > { %355 = sbr.rel (%p352_p2) target bundleno = 787 (0x313), region = 86  ;;  %s1365_s23 = sshll.u32 (!%p352_p2), %s358_s19, 5 }
  0x33   : > { %p402_p3 = scmp.lt.s32.totalorder (!%p352_p2), %s1366_s17, 31  ;;  %s1962_s18 = sshll.u32 (!%p352_p2), %s1791_s15, 4 }
  0x34   : > { %p408_p4 = scmp.lt.s32.totalorder (!%p352_p2), %s1962_s18, 31  ;;  %s1974_s20 = scalar_lea.vmem (!%p352_p2), [#allocation5], %s1365_s23 }
  0x35   : > { %s2248_s15 = sand.u32 (!%p352_p2), 1, %s1771_s10   ;;  %p1370_p5 = scmp.ne.s32.totalorder (!%p352_p2), %s1787_s14, 0 }
  0x36   : > { %s1978_s6 = scalar_lea.vmem (!%p352_p2), [#allocation6], %s2248_s15 }
  0x39   : > { %s2267_s17 = smov (!%p402_p3, %s1366_s17), 31  ;;  %417 = sbr.rel (%p1370_p5) target bundleno = 78 (0x4e), region = 94 }
  0x3a   : > { %s409_s22 = scalar_select %p408_p4, %s1962_s18, 31 }
  0x3b   : > { %s1367_s26 = sshll.u32 %s2267_s17, 2  ;;  %s418_s30 = sld [smem:[#allocation3]] (!%p1370_p5)  ;;  %vm453_vm0 = vcmask (!%p1370_p5), 130048  }
  0x3c   : > { %s1969_s21 = scalar_lea.vmem %s2226_s1, %s1367_s26  ;;  %s1369_s0 = sshll.u32 %s409_s22, 3 }
  0x3d   : > { %s411_s19 = scalar_lea.vmem %s2227_s2, %s1369_s0 }
  0x3e   : > { %v420_v4 = vld [vmem:[%s411_s19] sm:$0xff] (!%p1370_p5)  ;;  %v421_v5 = vld [vmem:[%s411_s19 + $0x8] sm:$0xff] (!%p1370_p5)  ;;  %v422_v6 = vld [vmem:[%s411_s19 + $0x10] sm:$0xff] (!%p1370_p5) }
  0x3f   : > { %v423_v7 = vld [vmem:[%s411_s19 + $0x18] sm:$0xff] (!%p1370_p5)  ;;  %v424_v8 = vld [vmem:[%s411_s19 + $0x20] sm:$0xff] (!%p1370_p5)  ;;  %v425_v9 = vld [vmem:[%s411_s19 + $0x28] sm:$0xff] (!%p1370_p5) }
  0x40   : > { %v426_v10 = vld [vmem:[%s411_s19 + $0x30] sm:$0xff]  ;;  %v427_v11 = vld [vmem:[%s411_s19 + $0x38] sm:$0xff]  ;;  %v428_v12 = vld [vmem:[%s411_s19 + $0x40] sm:$0xff] }
  0x41   : > { %s419_s17 = sadd.f32 1.0, %s418_s30  ;;  %v429_v13 = vld [vmem:[%s411_s19 + $0x48] sm:$0xff]  ;;  %v430_v15 = vld [vmem:[%s411_s19 + $0x50] sm:$0xff]  ;;  %v431_v16 = vld [vmem:[%s411_s19 + $0x58] sm:$0xff] }
  0x42   : > { %v432_v17 = vld [vmem:[%s411_s19 + $0x60] sm:$0xff]  ;;  %v433_v22 = vld [vmem:[%s411_s19 + $0x68] sm:$0xff]  ;;  %v434_v23 = vld [vmem:[%s411_s19 + $0x70] sm:$0xff] }
  0x43   : > { %v436_v14 = vstv %s419_s17  ;;  %v435_v24 = vld [vmem:[%s411_s19 + $0x78] sm:$0xff] }
  0x44   : > { %v437_v18 = vmul.f32 %v436_v14, %v420_v4  ;;  %v438_v19 = vmul.f32 %v436_v14, %v421_v5  ;;  %v439_v20 = vmul.f32 %v436_v14, %v422_v6  ;;  %v440_v21 = vmul.f32 %v436_v14, %v423_v7 }
  0x45   : > { %v441_v25 = vmul.f32 %v436_v14, %v424_v8  ;;  %v442_v26 = vmul.f32 %v436_v14, %v425_v9  ;;  %v443_v27 = vmul.f32 %v436_v14, %v426_v10  ;;  %v444_v28 = vmul.f32 %v436_v14, %v427_v11 }
  0x46   : > { %454 = vst.msk [vmem:[#allocation2] sm:$0xff] %vm453_vm0, %v437_v18  ;;  %455 = vst.msk [vmem:[#allocation2 + $0x8] sm:$0xff] %vm453_vm0, %v438_v19  ;;  %v445_v29 = vmul.f32 %v436_v14, %v428_v12  ;;  %v446_v30 = vmul.f32 %v436_v14, %v429_v13  ;;  %v447_v31 = vmul.f32 %v436_v14, %v430_v15 }
  0x47   : > { %456 = vst.msk [vmem:[#allocation2 + $0x10] sm:$0xff] %vm453_vm0, %v439_v20  ;;  %457 = vst.msk [vmem:[#allocation2 + $0x18] sm:$0xff] %vm453_vm0, %v440_v21  ;;  %v448_v32 = vmul.f32 %v436_v14, %v431_v16  ;;  %v449_v33 = vmul.f32 %v436_v14, %v432_v17  ;;  %v450_v34 = vmul.f32 %v436_v14, %v433_v22 }
  0x48   : > { %458 = vst.msk [vmem:[#allocation2 + $0x20] sm:$0xff] %vm453_vm0, %v441_v25  ;;  %459 = vst.msk [vmem:[#allocation2 + $0x28] sm:$0xff] %vm453_vm0, %v442_v26  ;;  %v451_v35 = vmul.f32 %v436_v14, %v434_v23  ;;  %v452_v36 = vmul.f32 %v436_v14, %v435_v24 }
  0x49   : > { %460 = vst.msk [vmem:[#allocation2 + $0x30] sm:$0xff] %vm453_vm0, %v443_v27  ;;  %461 = vst.msk [vmem:[#allocation2 + $0x38] sm:$0xff] %vm453_vm0, %v444_v28 }
  0x4a   : > { %462 = vst.msk [vmem:[#allocation2 + $0x40] sm:$0xff] %vm453_vm0, %v445_v29  ;;  %463 = vst.msk [vmem:[#allocation2 + $0x48] sm:$0xff] %vm453_vm0, %v446_v30 }
  0x4b   : > { %464 = vst.msk [vmem:[#allocation2 + $0x50] sm:$0xff] %vm453_vm0, %v447_v31  ;;  %465 = vst.msk [vmem:[#allocation2 + $0x58] sm:$0xff] %vm453_vm0, %v448_v32 }
  0x4c   : > { %466 = vst.msk [vmem:[#allocation2 + $0x60] sm:$0xff] %vm453_vm0, %v449_v33  ;;  %467 = vst.msk [vmem:[#allocation2 + $0x68] sm:$0xff] %vm453_vm0, %v450_v34 }
  0x4d   : > { %468 = vst.msk [vmem:[#allocation2 + $0x70] sm:$0xff] %vm453_vm0, %v451_v35  ;;  %469 = vst.msk [vmem:[#allocation2 + $0x78] sm:$0xff] %vm453_vm0, %v452_v36 }
  0x4e PF: > { %v1621_v37 = vld [vmem:[%s1969_s21] sm:$0xff]   ;;  %v1622_v38 = vld [vmem:[%s1969_s21 + $0x8] sm:$0xff]   ;;  %v1623_v39 = vld [vmem:[%s1969_s21 + $0x10] sm:$0xff]   ;;  %vm675_vm1 = vcmask 130048   ;;  %p1379_p6 = scmp.ne.s32.totalorder %s1787_s14, 1 }
  0x4f   : > { %1452 = vmatprep.subr.bf16.mxu0 %v1621_v37  ;;  %1516 = vmatprep.subr.bf16.mxu1 %v1621_v37  ;;  %v1624_v40 = vld [vmem:[%s1969_s21 + $0x18] sm:$0xff]   ;;  %v486_v41 = vld [vmem:[%s1974_s20] sm:$0xff]  ;;  %v488_v42 = vld [vmem:[%s1974_s20 + $0x10] sm:$0xff]  ;;  %vm953_vm2 = vcmask (!%p1379_p6), 261120   ;;  %s1002_s27 = sld [smem:[#allocation4]] (!%p1379_p6)  ;;  %vm1143_vm3 = vcmask (!%p1379_p6), 130112  }
  0x50   : > { %1453 = vmatpush3.bf16.msra.mxu0 %v1621_v37  ;;  %1524 = vmatpush3.bf16.msra.mxu1 %v1621_v37  ;;  %v490_v43 = vunpack.c.l.s8.bf16 %v486_v41  ;;  %v494_v44 = vunpack.c.l.s8.bf16 %v488_v42  ;;  %v1625_v45 = vld [vmem:[%s1969_s21 + $0x20] sm:$0xff]   ;;  %v1626_v46 = vld [vmem:[%s1969_s21 + $0x28] sm:$0xff]   ;;  %v1627_v47 = vld [vmem:[%s1969_s21 + $0x30] sm:$0xff]   ;;  %v491_v51 = vunpack.c.h.s8.bf16 %v486_v41  ;;  %v495_v52 = vunpack.c.h.s8.bf16 %v488_v42 }
  0x51   : > { %1454 = vmatprep.subr.bf16.mxu0 %v1622_v38  ;;  %1517 = vmatprep.subr.bf16.mxu1 %v1622_v38  ;;  %v1628_v48 = vld [vmem:[%s1969_s21 + $0x38] sm:$0xff]   ;;  %v487_v49 = vld [vmem:[%s1974_s20 + $0x8] sm:$0xff]  ;;  %v472_v57 = vld [vmem:[#allocation2 + $0x10] sm:$0xff]  ;;  %vm1150_vm4 = vcmask (!%p1379_p6), 195712   ;;  %vm1157_vm5 = vcmask (!%p1379_p6), 261312   ;;  %vm1164_vm6 = vcmask (!%p1379_p6), 326912  }
  0x52   : > { %1468 = vmatprep.mubr.bf16.mxu0 %v490_v43  ;;  %1476 = vmatprep.mubr.bf16.mxu1 %v494_v44  ;;  %v489_v50 = vld [vmem:[%s1974_s20 + $0x18] sm:$0xff]  ;;  %v492_v53 = vunpack.c.l.s8.bf16 %v487_v49  ;;  %v493_v55 = vunpack.c.h.s8.bf16 %v487_v49  ;;  %v480_v58 = vld [vmem:[#allocation2 + $0x50] sm:$0xff]  ;;  %v470_v59 = vld [vmem:[#allocation2] sm:$0xff]  ;;  %vm1171_vm7 = vcmask (!%p1379_p6), 392512   ;;  %vm1178_vm8 = vcmask (!%p1379_p6), 458112  }
  0x53   : > { %v496_v54 = vunpack.c.l.s8.bf16 %v489_v50  ;;  %v497_v56 = vunpack.c.h.s8.bf16 %v489_v50  ;;  %v478_v60 = vld [vmem:[#allocation2 + $0x40] sm:$0xff]  ;;  %v473_v63 = vld [vmem:[#allocation2 + $0x18] sm:$0xff]  ;;  %v471_v5 = vld [vmem:[#allocation2 + $0x8] sm:$0xff]  ;;  %vm1185_vm9 = vcmask (!%p1379_p6), 523712   ;;  %vm1192_vm10 = vcmask (!%p1379_p6), 589312  }
  0x54   : > { %1455 = vmatpush3.bf16.msra.mxu0 %v1622_v38  ;;  %1525 = vmatpush3.bf16.msra.mxu1 %v1622_v38  ;;  %v481_v0 = vld [vmem:[#allocation2 + $0x58] sm:$0xff]  ;;  %v479_v6 = vld [vmem:[#allocation2 + $0x48] sm:$0xff]  ;;  %v476_v17 = vld [vmem:[#allocation2 + $0x30] sm:$0xff]  ;;  %vm1199_vm11 = vcmask (!%p1379_p6), 654912   ;;  %vm1206_vm12 = vcmask (!%p1379_p6), 720512   ;;  %vm1213_vm13 = vcmask (!%p1379_p6), 786112  }
  0x55   : > { %1456 = vmatprep.subr.bf16.mxu0 %v1623_v39  ;;  %1518 = vmatprep.subr.bf16.mxu1 %v1623_v39  ;;  %v484_v18 = vld [vmem:[#allocation2 + $0x70] sm:$0xff]  ;;  %v474_v19 = vld [vmem:[#allocation2 + $0x20] sm:$0xff]  ;;  %v477_v23 = vld [vmem:[#allocation2 + $0x38] sm:$0xff]  ;;  %vm1220_vm14 = vcmask (!%p1379_p6), 851712   ;;  %vm1227_vm15 = vcmask (!%p1379_p6), 917312   ;;  %vm1234_vm0 = vcmask (!%p1379_p6), 982912  }
  0x56   : > { %v482_v20 = vld [vmem:[#allocation2 + $0x60] sm:$0xff]  ;;  %v485_v24 = vld [vmem:[#allocation2 + $0x78] sm:$0xff]  ;;  %v475_v29 = vld [vmem:[#allocation2 + $0x28] sm:$0xff] }
  0x57   : > { %v483_v30 = vld [vmem:[#allocation2 + $0x68] sm:$0xff]  ;;  %v712_v41 = vld [vmem:[%s2228_s3] sm:$0xff] (!%p1379_p6) }
  0x58   : > { %1457 = vmatpush3.bf16.msra.mxu0 %v1623_v39  ;;  %1526 = vmatpush3.bf16.msra.mxu1 %v1623_v39  ;;  %v713_v42 = vld [vmem:[%s2228_s3 + $0x8] sm:$0xff] (!%p1379_p6) }
  0x59   : > { %1458 = vmatprep.subr.bf16.mxu0 %v1624_v40  ;;  %1519 = vmatprep.subr.bf16.mxu1 %v1624_v40  ;;  %v1512_v44 = vpack.c.bf16 (!%p1379_p6), %v713_v42, %v712_v41 }
  0x5c   : > { %1459 = vmatpush3.bf16.msra.mxu0 %v1624_v40  ;;  %1527 = vmatpush3.bf16.msra.mxu1 %v1624_v40 }
  0x5d   : > { %1460 = vmatprep.subr.bf16.mxu0 %v1625_v45  ;;  %1520 = vmatprep.subr.bf16.mxu1 %v1625_v45 }
  0x60   : > { %1461 = vmatpush3.bf16.msra.mxu0 %v1625_v45  ;;  %1528 = vmatpush3.bf16.msra.mxu1 %v1625_v45 }
  0x61   : > { %1462 = vmatprep.subr.bf16.mxu0 %v1626_v46  ;;  %1521 = vmatprep.subr.bf16.mxu1 %v1626_v46 }
  0x64   : > { %1463 = vmatpush3.bf16.msra.mxu0 %v1626_v46  ;;  %1529 = vmatpush3.bf16.msra.mxu1 %v1626_v46 }
  0x65   : > { %1464 = vmatprep.subr.bf16.mxu0 %v1627_v47  ;;  %1522 = vmatprep.subr.bf16.mxu1 %v1627_v47 }
  0x68   : > { %1465 = vmatpush3.bf16.msra.mxu0 %v1627_v47  ;;  %1530 = vmatpush3.bf16.msra.mxu1 %v1627_v47 }
  0x69   : > { %1466 = vmatprep.subr.bf16.mxu0 %v1628_v48  ;;  %1523 = vmatprep.subr.bf16.mxu1 %v1628_v48 }
  0x6c   : > { %1467 = vmatpush3.bf16.msra.mxu0 %v1628_v48  ;;  %1531 = vmatpush3.bf16.msra.mxu1 %v1628_v48 }
  0x6d   : > { %1513 = vmatprep.subr.bf16.mxu0 (!%p1379_p6), %v1512_v44  ;;  %1532 = vmatprep.subr.bf16.mxu1 (!%p1379_p6), %v1512_v44 }
  0x6f   : > { %1469 = vmatmul.mubr.bf16.vlgmr.msra.gmra.mrb[0].mxu0 %v491_v51  ;;  %1477 = vmatmul.mubr.bf16.vlgmr.msra.gmra.mrb[0].mxu1 %v495_v52 }
  0x70   : > { %1472 = vmatprep.mubr.bf16.mxu0 %v492_v53  ;;  %1480 = vmatprep.mubr.bf16.mxu1 %v496_v54 }
  0x71   : > { %1515 = vmatpush3.bf16.msra.mxu0 (!%p1379_p6), %v1512_v44  ;;  %1533 = vmatpush3.bf16.msra.mxu1 (!%p1379_p6), %v1512_v44 }
  0x77   : > { %1473 = vmatmul.mubr.bf16.gmra.mrb[4].mxu0 %v493_v55  ;;  %1481 = vmatmul.mubr.bf16.gmra.mrb[4].mxu1 %v497_v56 }
 0x142   : > { %v1470_v61 = vpop.f32.mrb[0].mxu0  ;;  %v1478_v62 = vpop.f32.mrb[0].mxu1 }
 0x143   : > { %v661_v1 = vadd.f32 %v1470_v61, %v472_v57  ;;  %v669_v2 = vadd.f32 %v1478_v62, %v480_v58  ;;  %v596_v3 = vpop.f32.mrb[1].mxu0  ;;  %v628_v4 = vpop.f32.mrb[1].mxu1 }
 0x144   : > { %v659_v7 = vadd.f32 %v596_v3, %v470_v59  ;;  %v667_v8 = vadd.f32 %v628_v4, %v478_v60  ;;  %v1471_v9 = vpop.f32.mrb[2].mxu0  ;;  %v1479_v10 = vpop.f32.mrb[2].mxu1  ;;  %v2051_v60 = vld [vmem:[%s2229_s4] ss:$0 sm:$0xff] (!%p1379_p6) }
 0x145   : > { %678 = vst.msk [vmem:[#allocation2 + $0x10] sm:$0xff] %vm675_vm1, %v661_v1  ;;  %686 = vst.msk [vmem:[#allocation2 + $0x50] sm:$0xff] %vm675_vm1, %v669_v2  ;;  %v662_v11 = vadd.f32 %v1471_v9, %v473_v63  ;;  %v670_v12 = vadd.f32 %v1479_v10, %v481_v0  ;;  %v599_v13 = vpop.f32.mrb[3].mxu0  ;;  %v631_v14 = vpop.f32.mrb[3].mxu1 }
 0x146   : > { %676 = vst.msk [vmem:[#allocation2] sm:$0xff] %vm675_vm1, %v659_v7  ;;  %684 = vst.msk [vmem:[#allocation2 + $0x40] sm:$0xff] %vm675_vm1, %v667_v8  ;;  %v660_v15 = vadd.f32 %v599_v13, %v471_v5  ;;  %v668_v16 = vadd.f32 %v631_v14, %v479_v6  ;;  %v2060_v5 = vld [vmem:[%s2230_s5] ss:$0 sm:$0xff] (!%p1379_p6) }
 0x147   : > { %679 = vst.msk [vmem:[#allocation2 + $0x18] sm:$0xff] %vm675_vm1, %v662_v11  ;;  %687 = vst.msk [vmem:[#allocation2 + $0x58] sm:$0xff] %vm675_vm1, %v670_v12 }
 0x148   : > { %677 = vst.msk [vmem:[#allocation2 + $0x8] sm:$0xff] %vm675_vm1, %v660_v15  ;;  %685 = vst.msk [vmem:[#allocation2 + $0x48] sm:$0xff] %vm675_vm1, %v668_v16 }
 0x14a   : > { %v1474_v21 = vpop.f32.mrb[4].mxu0  ;;  %v1482_v22 = vpop.f32.mrb[4].mxu1  ;;  %695 = sbr.rel (%p1379_p6) target bundleno = 762 (0x2fa), region = 98 }
 0x14b   : > { %v665_v25 = vadd.f32 %v1474_v21, %v476_v17  ;;  %v673_v26 = vadd.f32 %v1482_v22, %v484_v18  ;;  %v612_v27 = vpop.f32.mrb[5].mxu0  ;;  %v644_v28 = vpop.f32.mrb[5].mxu1 }
 0x14c   : > { %v663_v31 = vadd.f32 %v612_v27, %v474_v19  ;;  %v671_v32 = vadd.f32 %v644_v28, %v482_v20  ;;  %v1475_v33 = vpop.f32.mrb[6].mxu0  ;;  %v1483_v34 = vpop.f32.mrb[6].mxu1  ;;  %v698_v48 = vld [vmem:[#allocation2 + $0x10] sm:$0xff] (!%p1379_p6) }
 0x14d   : > { %682 = vst.msk [vmem:[#allocation2 + $0x30] sm:$0xff] %vm675_vm1, %v665_v25  ;;  %690 = vst.msk [vmem:[#allocation2 + $0x70] sm:$0xff] %vm675_vm1, %v673_v26  ;;  %v666_v35 = vadd.f32 %v1475_v33, %v477_v23  ;;  %v674_v36 = vadd.f32 %v1483_v34, %v485_v24  ;;  %v615_v37 = vpop.f32.mrb[7].mxu0  ;;  %v647_v38 = vpop.f32.mrb[7].mxu1  ;;  %v696_v43 = vld [vmem:[#allocation2] sm:$0xff] (!%p1379_p6)  ;;  %v706_v49 = vld [vmem:[#allocation2 + $0x50] sm:$0xff] (!%p1379_p6) }
 0x14e   : > { %680 = vst.msk [vmem:[#allocation2 + $0x20] sm:$0xff] %vm675_vm1, %v663_v31  ;;  %688 = vst.msk [vmem:[#allocation2 + $0x60] sm:$0xff] %vm675_vm1, %v671_v32  ;;  %v664_v39 = vadd.f32 %v615_v37, %v475_v29  ;;  %v672_v40 = vadd.f32 %v647_v38, %v483_v30  ;;  %1488 = vmatprep.mubr.msk.f32.mxu0 (!%p1379_p6), %vm675_vm1, %v696_v43  ;;  %v704_v45 = vld [vmem:[#allocation2 + $0x40] sm:$0xff] (!%p1379_p6)  ;;  %v699_v50 = vld [vmem:[#allocation2 + $0x18] sm:$0xff] (!%p1379_p6) }
 0x14f   : > { %683 = vst.msk [vmem:[#allocation2 + $0x38] sm:$0xff] %vm675_vm1, %v666_v35  ;;  %691 = vst.msk [vmem:[#allocation2 + $0x78] sm:$0xff] %vm675_vm1, %v674_v36  ;;  %1500 = vmatprep.mubr.msk.f32.mxu1 (!%p1379_p6), %vm675_vm1, %v704_v45  ;;  %v697_v46 = vld [vmem:[#allocation2 + $0x8] sm:$0xff] (!%p1379_p6)  ;;  %v707_v51 = vld [vmem:[#allocation2 + $0x58] sm:$0xff] (!%p1379_p6) }
 0x150   : > { %681 = vst.msk [vmem:[#allocation2 + $0x28] sm:$0xff] %vm675_vm1, %v664_v39  ;;  %689 = vst.msk [vmem:[#allocation2 + $0x68] sm:$0xff] %vm675_vm1, %v672_v40  ;;  %v705_v47 = vld [vmem:[#allocation2 + $0x48] sm:$0xff] (!%p1379_p6)  ;;  %1489 = vmatmul.mubr.msk.f32.vlgmr.msra.gmra.mrb[0].mxu0 (!%p1379_p6), %vm675_vm1, %v697_v46 }
 0x151   : > { %1501 = vmatmul.mubr.msk.f32.vlgmr.msra.gmra.mrb[0].mxu1 %vm675_vm1, %v705_v47  ;;  %1491 = vmatprep.mubr.msk.f32.mxu0 %vm675_vm1, %v698_v48 }
 0x152   : > { %1503 = vmatprep.mubr.msk.f32.mxu1 %vm675_vm1, %v706_v49 }
 0x154   : > { %1492 = vmatmul.mubr.msk.f32.gmra.mrb[2].mxu0 %vm675_vm1, %v699_v50  ;;  %v702_v56 = vld [vmem:[#allocation2 + $0x30] sm:$0xff] }
 0x155   : > { %v700_v52 = vld [vmem:[#allocation2 + $0x20] sm:$0xff]  ;;  %1504 = vmatmul.mubr.msk.f32.gmra.mrb[2].mxu1 %vm675_vm1, %v707_v51  ;;  %v710_v57 = vld [vmem:[#allocation2 + $0x70] sm:$0xff] }
 0x156   : > { %v708_v53 = vld [vmem:[#allocation2 + $0x60] sm:$0xff]  ;;  %1494 = vmatprep.mubr.msk.f32.mxu0 %vm675_vm1, %v700_v52  ;;  %v703_v58 = vld [vmem:[#allocation2 + $0x38] sm:$0xff] }
 0x157   : > { %v701_v54 = vld [vmem:[#allocation2 + $0x28] sm:$0xff]  ;;  %1506 = vmatprep.mubr.msk.f32.mxu1 %vm675_vm1, %v708_v53  ;;  %v711_v59 = vld [vmem:[#allocation2 + $0x78] sm:$0xff] }
 0x158   : > { %v709_v55 = vld [vmem:[#allocation2 + $0x68] sm:$0xff]  ;;  %1495 = vmatmul.mubr.msk.f32.gmra.mrb[4].mxu0 %vm675_vm1, %v701_v54 }
 0x159   : > { %1507 = vmatmul.mubr.msk.f32.gmra.mrb[4].mxu1 %vm675_vm1, %v709_v55  ;;  %1497 = vmatprep.mubr.msk.f32.mxu0 %vm675_vm1, %v702_v56 }
 0x15a   : > { %1509 = vmatprep.mubr.msk.f32.mxu1 %vm675_vm1, %v710_v57 }
 0x15c   : > { %1498 = vmatmul.mubr.msk.f32.gmra.mrb[6].mxu0 %vm675_vm1, %v703_v58 }
 0x15d   : > { %1510 = vmatmul.mubr.msk.f32.gmra.mrb[6].mxu1 %vm675_vm1, %v711_v59  ;;  %vm1241_vm1 = vcmask 1048512  }
 0x223   : > { %v1490_v61 = vpop.f32.mrb[0].mxu0 }
 0x224   : > { %v1502_v62 = vpop.f32.mrb[0].mxu1  ;;  %v841_v63 = vadd.f32 %v1490_v61, %v2051_v60  ;;  %v835_v1 = vpop.f32.mrb[1].mxu0 }
 0x225   : > { %v881_v0 = vadd.f32 %v1502_v62, %v2051_v60  ;;  %v875_v2 = vpop.f32.mrb[1].mxu1  ;;  %v836_v3 = vadd.f32 %v2051_v60, %v835_v1 }
 0x226   : > { %v876_v4 = vadd.f32 %v2051_v60, %v875_v2  ;;  %v915_v6 = vmax.f32 %v841_v63, 0.0 }
 0x227   : > { %v923_v7 = vmax.f32 %v881_v0, 0.0  ;;  %v914_v8 = vmax.f32 %v836_v3, 0.0  ;;  %v1493_v9 = vpop.f32.mrb[2].mxu0 }
 0x228   : > { %v1505_v10 = vpop.f32.mrb[2].mxu1  ;;  %v851_v11 = vadd.f32 %v1493_v9, %v2051_v60  ;;  %v845_v12 = vpop.f32.mrb[3].mxu0  ;;  %v938_v15 = vmul.f32 %v2060_v5, %v915_v6  ;;  %v922_v17 = vmax.f32 %v876_v4, 0.0 }
 0x229   : > { %v946_v13 = vmul.f32 %v2060_v5, %v923_v7  ;;  %v891_v14 = vadd.f32 %v1505_v10, %v2051_v60  ;;  %v885_v16 = vpop.f32.mrb[3].mxu1  ;;  %v846_v18 = vadd.f32 %v2051_v60, %v845_v12  ;;  %v937_v20 = vmul.f32 %v2060_v5, %v914_v8 }
 0x22a   : > { %v886_v19 = vadd.f32 %v2051_v60, %v885_v16  ;;  %v917_v21 = vmax.f32 %v851_v11, 0.0  ;;  %v957_v24 = vsel %vm953_vm2, %v938_v15, 0.0  ;;  %v945_v33 = vmul.f32 %v2060_v5, %v922_v17 }
 0x22b   : > { %v981_v22 = vsel %vm953_vm2, %v946_v13, 0.0  ;;  %v925_v23 = vmax.f32 %v891_v14, 0.0  ;;  %958 = vadd.xlane.f32.xlu0 %v957_v24  ;;  %v1496_v25 = vpop.f32.mrb[4].mxu0  ;;  %v916_v34 = vmax.f32 %v846_v18, 0.0  ;;  %v954_v37 = vsel %vm953_vm2, %v937_v20, 0.0 }
 0x22c   : > { %982 = vadd.xlane.f32.xlu1 %v981_v22  ;;  %v1508_v26 = vpop.f32.mrb[4].mxu1  ;;  %v940_v27 = vmul.f32 %v2060_v5, %v917_v21  ;;  %v861_v28 = vadd.f32 %v1496_v25, %v2051_v60  ;;  %v855_v29 = vpop.f32.mrb[5].mxu0  ;;  %v924_v35 = vmax.f32 %v886_v19, 0.0  ;;  %v978_v47 = vsel %vm953_vm2, %v945_v33, 0.0 }
 0x22d   : > { %v948_v30 = vmul.f32 %v2060_v5, %v925_v23  ;;  %v895_v31 = vpop.f32.mrb[5].mxu1  ;;  %v856_v32 = vadd.f32 %v2051_v60, %v855_v29  ;;  %v939_v48 = vmul.f32 %v2060_v5, %v916_v34  ;;  %v901_v50 = vadd.f32 %v1508_v26, %v2051_v60 }
 0x22e   : > { %v963_v36 = vsel %vm953_vm2, %v940_v27, 0.0  ;;  %v919_v40 = vmax.f32 %v861_v28, 0.0  ;;  %v947_v49 = vmul.f32 %v2060_v5, %v924_v35  ;;  %v896_v51 = vadd.f32 %v2051_v60, %v895_v31 }
 0x22f   : > { %955 = vadd.xlane.f32.xlu0 %v954_v37  ;;  %v1499_v38 = vpop.f32.mrb[6].mxu0  ;;  %v918_v41 = vmax.f32 %v856_v32, 0.0  ;;  %v987_v42 = vsel %vm953_vm2, %v948_v30, 0.0  ;;  %v960_v56 = vsel %vm953_vm2, %v939_v48, 0.0  ;;  %v927_v58 = vmax.f32 %v901_v50, 0.0 }
 0x230   : > { %964 = vadd.xlane.f32.xlu1 %v963_v36  ;;  %v1511_v39 = vpop.f32.mrb[6].mxu1  ;;  %v871_v43 = vadd.f32 %v1499_v38, %v2051_v60  ;;  %v865_v44 = vpop.f32.mrb[7].mxu0  ;;  %v942_v54 = vmul.f32 %v2060_v5, %v919_v40  ;;  %v984_v57 = vsel %vm953_vm2, %v947_v49, 0.0  ;;  %v926_v59 = vmax.f32 %v896_v51, 0.0 }
 0x231   : > { %v905_v45 = vpop.f32.mrb[7].mxu1  ;;  %v866_v46 = vadd.f32 %v2051_v60, %v865_v44  ;;  %v941_v55 = vmul.f32 %v2060_v5, %v918_v41  ;;  %v911_v61 = vadd.f32 %v1511_v39, %v2051_v60  ;;  %v950_v3 = vmul.f32 %v2060_v5, %v927_v58 }
 0x232   : > { %v921_v52 = vmax.f32 %v871_v43, 0.0  ;;  %v906_v62 = vadd.f32 %v2051_v60, %v905_v45  ;;  %v969_v63 = vsel %vm953_vm2, %v942_v54, 0.0  ;;  %v949_v4 = vmul.f32 %v2060_v5, %v926_v59 }
 0x233   : > { %979 = vadd.xlane.f32.xlu0 %v978_v47  ;;  %v920_v53 = vmax.f32 %v866_v46, 0.0  ;;  %v966_v0 = vsel %vm953_vm2, %v941_v55, 0.0  ;;  %v929_v6 = vmax.f32 %v911_v61, 0.0  ;;  %v993_v9 = vsel %vm953_vm2, %v950_v3, 0.0 }
 0x234   : > { %988 = vadd.xlane.f32.xlu1 %v987_v42  ;;  %v944_v1 = vmul.f32 %v2060_v5, %v921_v52  ;;  %v928_v7 = vmax.f32 %v906_v62, 0.0  ;;  %v990_v10 = vsel %vm953_vm2, %v949_v4, 0.0  ;;  %v2106_v15 = vstv %s1002_s27 }
 0x235   : > { %v943_v2 = vmul.f32 %v2060_v5, %v920_v53  ;;  %v952_v11 = vmul.f32 %v2060_v5, %v929_v6  ;;  %v1132_v62 = vlaneseq }
 0x236   : > { %v975_v8 = vsel %vm953_vm2, %v944_v1, 0.0  ;;  %v951_v12 = vmul.f32 %v2060_v5, %v928_v7 }
 0x237   : > { %985 = vadd.xlane.f32.xlu0 %v984_v57  ;;  %v972_v60 = vsel %vm953_vm2, %v943_v2, 0.0  ;;  %v999_v13 = vsel %vm953_vm2, %v952_v11, 0.0 }
 0x238   : > { %961 = vadd.xlane.f32.xlu1 %v960_v56  ;;  %v996_v14 = vsel %vm953_vm2, %v951_v12, 0.0 }
 0x23b   : > { %967 = vadd.xlane.f32.xlu0 %v966_v0 }
 0x23c   : > { %970 = vadd.xlane.f32.xlu1 %v969_v63 }
 0x23f   : > { %973 = vadd.xlane.f32.xlu0 %v972_v60 }
 0x240   : > { %976 = vadd.xlane.f32.xlu1 %v975_v8 }
 0x243   : > { %991 = vadd.xlane.f32.xlu0 %v990_v10  ;;  %v2124_v10 = vand.u32 127, %v1132_v62 }
 0x244   : > { %994 = vadd.xlane.f32.xlu1 %v993_v9 }
 0x247   : > { %997 = vadd.xlane.f32.xlu0 %v996_v14 }
 0x248   : > { %1000 = vadd.xlane.f32.xlu1 %v999_v13 }
 0x2b8   : > { %v959_v17 = vpop.xlane.xlu0 %958 }
 0x2b9   : > { %v983_v16 = vpop.xlane.xlu1 %982  ;;  %v1005_v18 = vadd.f32 %v2106_v15, %v959_v17 }
 0x2ba   : > { %v1013_v26 = vadd.f32 %v2106_v15, %v983_v16 }
 0x2bb   : > { %v1399_v19 = vmul.f32 -1.442695, %v1005_v18  ;;  %v1145_v18 = vadd.s32 4294967280, %v2124_v10 }
 0x2bc   : > { %v956_v21 = vpop.xlane.xlu0 %955  ;;  %v1407_v33 = vmul.f32 -1.442695, %v1013_v26 }
 0x2bd   : > { %v965_v20 = vpop.xlane.xlu1 %964  ;;  %v1004_v5 = vadd.f32 %v2106_v15, %v956_v21  ;;  %1629 = vpow2.f32 %v1399_v19 }
 0x2be   : > { %v1007_v23 = vadd.f32 %v2106_v15, %v965_v20  ;;  %v2127_v20 = vshrl.u32 %v1132_v62, 7 }
 0x2bf   : > { %v1398_v22 = vmul.f32 -1.442695, %v1004_v5 }
 0x2c0   : > { %v980_v25 = vpop.xlane.xlu0 %979  ;;  %v1401_v27 = vmul.f32 -1.442695, %v1007_v23  ;;  %v1136_v26 = vsub.s32 %v2124_v10, %v2127_v20 }
 0x2c1   : > { %v989_v24 = vpop.xlane.xlu1 %988  ;;  %1631 = vpow2.f32 %v1398_v22  ;;  %v1012_v32 = vadd.f32 %v2106_v15, %v980_v25  ;;  %v1152_v22 = vadd.s32 4294967272, %v2124_v10 }
 0x2c2   : > { %v1015_v28 = vadd.f32 %v2106_v15, %v989_v24  ;;  %1633 = vpow2.f32 %v1401_v27 }
 0x2c3   : > { %v1406_v41 = vmul.f32 -1.442695, %v1012_v32 }
 0x2c4   : > { %v986_v30 = vpop.xlane.xlu0 %985  ;;  %v1409_v36 = vmul.f32 -1.442695, %v1015_v28 }
 0x2c5   : > { %v962_v29 = vpop.xlane.xlu1 %961  ;;  %v1014_v42 = vadd.f32 %v2106_v15, %v986_v30 }
 0x2c6   : > { %v1006_v31 = vadd.f32 %v2106_v15, %v962_v29  ;;  %v1148_v29 = vsub.s32 %v1145_v18, %v2127_v20 }
 0x2c7   : > { %v1630_v35 = vpop.eup %1629  ;;  %v1408_v51 = vmul.f32 -1.442695, %v1014_v42 }
 0x2c8   : > { %v1400_v34 = vmul.f32 -1.442695, %v1006_v31  ;;  %v968_v38 = vpop.xlane.xlu0 %967  ;;  %v1069_v43 = vadd.f32 1.0, %v1630_v35  ;;  %v2135_v31 = vadd.s32 4294967224, %v2124_v10 }
 0x2c9   : > { %v971_v37 = vpop.xlane.xlu1 %970  ;;  %v1008_v40 = vadd.f32 %v2106_v15, %v968_v38  ;;  %v1159_v38 = vadd.s32 4294967264, %v2124_v10 }
 0x2ca   : > { %1635 = vpow2.f32 %v1400_v34  ;;  %v1009_v39 = vadd.f32 %v2106_v15, %v971_v37 }
 0x2cb   : > { %1637 = vpow2.f32 %v1407_v33  ;;  %v1632_v45 = vpop.eup %1631  ;;  %v1402_v46 = vmul.f32 -1.442695, %v1008_v40 }
 0x2cc   : > { %v1403_v44 = vmul.f32 -1.442695, %v1009_v39  ;;  %1639 = vpow2.f32 %v1409_v36  ;;  %v974_v48 = vpop.xlane.xlu0 %973  ;;  %v1068_v52 = vadd.f32 1.0, %v1632_v45  ;;  %v1634_v59 = vpop.eup %1633  ;;  %v1155_v36 = vsub.s32 %v1152_v22, %v2127_v20 }
 0x2cd   : > { %v977_v47 = vpop.xlane.xlu1 %976  ;;  %v1010_v50 = vadd.f32 %v2106_v15, %v974_v48  ;;  %v1071_v6 = vadd.f32 1.0, %v1634_v59 }
 0x2ce   : > { %1641 = vpow2.f32 %v1403_v44  ;;  %v1011_v49 = vadd.f32 %v2106_v15, %v977_v47  ;;  %v1180_v47 = vadd.s32 4294967240, %v2124_v10 }
 0x2cf   : > { %1643 = vpow2.f32 %v1406_v41  ;;  %v1404_v54 = vmul.f32 -1.442695, %v1010_v50  ;;  %v1166_v41 = vadd.s32 4294967256, %v2124_v10  ;;  %v1162_v50 = vsub.s32 %v1159_v38, %v2127_v20 }
 0x2d0   : > { %1645 = vrcp.f32 %v1069_v43  ;;  %v1405_v53 = vmul.f32 -1.442695, %v1011_v49  ;;  %v992_v56 = vpop.xlane.xlu0 %991  ;;  %v1187_v49 = vadd.s32 4294967232, %v2124_v10  ;;  %v1183_v62 = vsub.s32 %v1180_v47, %v2127_v20 }
 0x2d1   : > { %1647 = vpow2.f32 %v1402_v46  ;;  %v995_v55 = vpop.xlane.xlu1 %994  ;;  %v1016_v58 = vadd.f32 %v2106_v15, %v992_v56 }
 0x2d2   : > { %1649 = vpow2.f32 %v1405_v53  ;;  %v1017_v57 = vadd.f32 %v2106_v15, %v995_v55  ;;  %v1169_v55 = vsub.s32 %v1166_v41, %v2127_v20 }
 0x2d3   : > { %1651 = vpow2.f32 %v1408_v51  ;;  %v1410_v0 = vmul.f32 -1.442695, %v1016_v58  ;;  %v1173_v51 = vadd.s32 4294967248, %v2124_v10 }
 0x2d4   : > { %v1636_v61 = vpop.eup %1635  ;;  %1653 = vrcp.f32 %v1068_v52  ;;  %v1411_v63 = vmul.f32 -1.442695, %v1017_v57  ;;  %v998_v3 = vpop.xlane.xlu0 %997 }
 0x2d5   : > { %v1070_v1 = vadd.f32 1.0, %v1636_v61  ;;  %1655 = vpow2.f32 %v1404_v54  ;;  %v1001_v2 = vpop.xlane.xlu1 %1000  ;;  %v1638_v4 = vpop.eup %1637  ;;  %v1018_v8 = vadd.f32 %v2106_v15, %v998_v3  ;;  %v1208_v54 = vadd.s32 4294967208, %v2124_v10 }
 0x2d6   : > { %1657 = vpow2.f32 %v1411_v63  ;;  %v1019_v7 = vadd.f32 %v2106_v15, %v1001_v2  ;;  %v1640_v60 = vpop.eup %1639  ;;  %v1138_v15 = vadd.s32 4294967288, %v2124_v10  ;;  %v1077_v28 = vadd.f32 1.0, %v1638_v4 }
 0x2d7   : > { %1659 = vrcp.f32 %v1070_v1  ;;  %v1412_v14 = vmul.f32 -1.442695, %v1018_v8  ;;  %v1079_v37 = vadd.f32 1.0, %v1640_v60  ;;  %v1201_v1 = vadd.s32 4294967216, %v2124_v10 }
 0x2d8   : > { %v1642_v9 = vpop.eup %1641  ;;  %1661 = vpow2.f32 %v1410_v0  ;;  %v1413_v11 = vmul.f32 -1.442695, %v1019_v7  ;;  %v1141_v32 = vsub.s32 %v1138_v15, %v2127_v20  ;;  %v1176_v3 = vsub.s32 %v1173_v51, %v2127_v20 }
 0x2d9   : > { %v1644_v12 = vpop.eup %1643  ;;  %v1073_v13 = vadd.f32 1.0, %v1642_v9  ;;  %1663 = vrcp.f32 %v1071_v6  ;;  %v1222_v7 = vadd.s32 4294967192, %v2124_v10  ;;  %v1190_v60 = vsub.s32 %v1187_v49, %v2127_v20 }
 0x2da   : > { %v1646_v16 = vpop.eup %1645  ;;  %v1076_v23 = vadd.f32 1.0, %v1644_v12  ;;  %v1204_v18 = vsub.s32 %v1201_v1, %v2127_v20  ;;  %v1229_v15 = vadd.s32 4294967184, %v2124_v10 }
 0x2db   : > { %v1648_v17 = vpop.eup %1647  ;;  %1665 = vrcp.f32 %v1073_v13  ;;  %v1142_v46 = vrot.slane %v1646_v16, %v1141_v32  ;;  %v1197_v13 = vsub.s32 %v2135_v31, %v2127_v20  ;;  %v1236_v16 = vadd.s32 4294967176, %v2124_v10 }
 0x2dc   : > { %v1650_v19 = vpop.eup %1649  ;;  %v1072_v21 = vadd.f32 1.0, %v1648_v17  ;;  %1667 = vpow2.f32 %v1413_v11  ;;  %v1215_v11 = vadd.s32 4294967200, %v2124_v10 }
 0x2dd   : > { %v1652_v5 = vpop.eup %1651  ;;  %v1075_v24 = vadd.f32 1.0, %v1650_v19  ;;  %1669 = vpow2.f32 %v1412_v14  ;;  %v1239_v31 = vsub.s32 %v1236_v16, %v2127_v20 }
 0x2de   : > { %v1654_v25 = vpop.eup %1653  ;;  %1671 = vrcp.f32 %v1072_v21  ;;  %v1078_v33 = vadd.f32 1.0, %v1652_v5  ;;  %v1211_v5 = vsub.s32 %v1208_v54, %v2127_v20 }
 0x2df   : > { %v1656_v27 = vpop.eup %1655  ;;  %1673 = vrcp.f32 %v1075_v24  ;;  %v1137_v40 = vrot.slane %v1654_v25, %v1136_v26 }
 0x2e0   : > { %v1658_v30 = vpop.eup %1657  ;;  %v1074_v34 = vadd.f32 1.0, %v1656_v27  ;;  %1675 = vrcp.f32 %v1076_v23  ;;  %v1225_v23 = vsub.s32 %v1222_v7, %v2127_v20  ;;  %v1218_v27 = vsub.s32 %v1215_v11, %v2127_v20 }
 0x2e1   : > { %v1660_v35 = vpop.eup %1659  ;;  %v1081_v43 = vadd.f32 1.0, %v1658_v30  ;;  %v1144_v53 = vsel %vm1143_vm3, %v1142_v46, %v1137_v40 }
 0x2e2   : > { %v1662_v39 = vpop.eup %1661  ;;  %1677 = vrcp.f32 %v1074_v34  ;;  %v1149_v42 = vrot.slane %v1660_v35, %v1148_v29  ;;  %v1232_v34 = vsub.s32 %v1229_v15, %v2127_v20 }
 0x2e3   : > { %1679 = vrcp.f32 %v1077_v28  ;;  %v1080_v44 = vadd.f32 1.0, %v1662_v39  ;;  %v1664_v45 = vpop.eup %1663 }
 0x2e4   : > { %1681 = vrcp.f32 %v1078_v33  ;;  %v1151_v57 = vsel %vm1150_vm4, %v1149_v42, %v1144_v53  ;;  %v1156_v61 = vrot.slane %v1664_v45, %v1155_v36 }
 0x2e5   : > { %v1666_v48 = vpop.eup %1665  ;;  %1683 = vrcp.f32 %v1079_v37 }
 0x2e6   : > { %v1668_v52 = vpop.eup %1667  ;;  %1685 = vrcp.f32 %v1080_v44  ;;  %v1170_v4 = vrot.slane %v1666_v48, %v1169_v55  ;;  %v1158_v6 = vsel %vm1157_vm5, %v1156_v61, %v1151_v57 }
 0x2e7   : > { %v1670_v56 = vpop.eup %1669  ;;  %1687 = vrcp.f32 %v1081_v43  ;;  %v1083_v58 = vadd.f32 1.0, %v1668_v52 }
 0x2e8   : > { %v1672_v59 = vpop.eup %1671  ;;  %v1082_v63 = vadd.f32 1.0, %v1670_v56 }
 0x2e9   : > { %v1674_v0 = vpop.eup %1673  ;;  %v1163_v2 = vrot.slane %v1672_v59, %v1162_v50  ;;  %1689 = vrcp.f32 %v1083_v58 }
 0x2ea   : > { %1691 = vrcp.f32 %v1082_v63  ;;  %v1676_v8 = vpop.eup %1675  ;;  %v1184_v14 = vrot.slane %v1674_v0, %v1183_v62 }
 0x2eb   : > { %v1165_v9 = vsel %vm1164_vm6, %v1163_v2, %v1158_v6  ;;  %v1191_v25 = vrot.slane %v1676_v8, %v1190_v60 }
 0x2ec   : > { %v1678_v12 = vpop.eup %1677  ;;  %v1172_v22 = vsel %vm1171_vm7, %v1170_v4, %v1165_v9 }
 0x2ed   : > { %v1680_v17 = vpop.eup %1679  ;;  %v1177_v19 = vrot.slane %v1678_v12, %v1176_v3 }
 0x2ee   : > { %v1682_v21 = vpop.eup %1681  ;;  %v1198_v29 = vrot.slane %v1680_v17, %v1197_v13 }
 0x2ef   : > { %v1684_v24 = vpop.eup %1683  ;;  %v1179_v26 = vsel %vm1178_vm8, %v1177_v19, %v1172_v22  ;;  %v1205_v32 = vrot.slane %v1682_v21, %v1204_v18 }
 0x2f0   : > { %v1686_v28 = vpop.eup %1685  ;;  %v1186_v30 = vsel %vm1185_vm9, %v1184_v14, %v1179_v26  ;;  %v1212_v35 = vrot.slane %v1684_v24, %v1211_v5 }
 0x2f1   : > { %v1688_v10 = vpop.eup %1687  ;;  %v1193_v33 = vsel %vm1192_vm10, %v1191_v25, %v1186_v30  ;;  %v1219_v39 = vrot.slane %v1686_v28, %v1218_v27 }
 0x2f2   : > { %v1200_v36 = vsel %vm1199_vm11, %v1198_v29, %v1193_v33  ;;  %v1226_v41 = vrot.slane %v1688_v10, %v1225_v23 }
 0x2f3   : > { %v1690_v37 = vpop.eup %1689  ;;  %v1207_v38 = vsel %vm1206_vm12, %v1205_v32, %v1200_v36 }
 0x2f4   : > { %v1692_v40 = vpop.eup %1691  ;;  %v1214_v42 = vsel %vm1213_vm13, %v1212_v35, %v1207_v38  ;;  %v1240_v43 = vrot.slane %v1690_v37, %v1239_v31 }
 0x2f5   : > { %v1221_v44 = vsel %vm1220_vm14, %v1219_v39, %v1214_v42  ;;  %v1233_v45 = vrot.slane %v1692_v40, %v1232_v34 }
 0x2f6   : > { %v1228_v46 = vsel %vm1227_vm15, %v1226_v41, %v1221_v44 }
 0x2f7   : > { %v1235_v47 = vsel %vm1234_vm0, %v1233_v45, %v1228_v46 }
 0x2f8   : > { %v1242_v48 = vsel %vm1241_vm1, %v1240_v43, %v1235_v47 }
 0x2f9   : > { %1244 = vst [vmem:[%s1978_s6] sm:$0x1] %v1242_v48 }
 0x2fa PF: > { %s2169_s12 = scalar_lea.hbm %s2233_s8, %s1962_s18  ;;  %s1258_s19 = sshll.u32 %s1978_s6, 4  ;;  %s1259_s19 = int_to_ptr.vmem [resolvable:$true] %s1258_s19 }
 0x2fb   : > { %s2249_s15 = sand.u32 1, %s1771_s10   ;;  %s1693_s0 = scalar_lea.vmem %s1259_s19, 16 }
 0x2fc   : > { %s1246_s17 = scalar_lea.sflag [#allocation7], %s2249_s15  ;;  %p1694_p8 = scmp.ne.s32.totalorder %s1259_s19, %s1693_s0 }
 0x2fd   : > { %s1805_s16 = smov [#allocation6]  }
 0x2fe   : > { %p1695_p9 = pnand %p1694_p8, %p1929_p7  ;;  %s1697_s30 = sshll.u32 %s1805_s16, 4  ;;  %s1698_s30 = int_to_ptr.vmem [resolvable:$false] %s1697_s30 }
 0x2ff   : > { %s1699_s20 = scalar_lea.vmem %s1698_s30, 32  ;;  %p1700_p11 = scmp.lt.s32.totalorder %s1259_s19, %s1698_s30 }
 0x300   : > { %p1696_p10 = pneg %p1695_p9  ;;  %p1701_p13 = scmp.lt.s32.totalorder %s1699_s20, %s1693_s0 }
 0x302   : > { %p1702_p0 = por %p1701_p13, %p1700_p11 }
 0x304   : > { %p1703_p1 = pnand %p1702_p0, %p1696_p10 }
 0x306   : > { %1706 = shalt.err (!%p1703_p1)
}
 0x307   : > { %s1707_s6 = scalar_lea.hbm %s2169_s12, 16  ;;  %s1711_s23 = scalar_lea.hbm %s2233_s8, 32 }
 0x308   : > { %p1708_p2 = scmp.ne.s32.totalorder %s2169_s12, %s1707_s6  ;;  %p1712_p5 = scmp.lt.u32.totalorder %s2169_s12, %s2233_s8 }
 0x309   : > { %p1713_p6 = scmp.lt.u32.totalorder %s1711_s23, %s1707_s6  ;;  %p1715_p9 = scmp.lt.u32.totalorder %s1707_s6, %s2169_s12 }
 0x30a   : > { %p1709_p3 = pnand %p1708_p2, %p1929_p7 }
 0x30b   : > { %p1714_p8 = por %p1713_p6, %p1712_p5 }
 0x30c   : > { %p1710_p4 = pneg %p1709_p3 }
 0x30d   : > { %p1716_p10 = por %p1715_p9, %p1714_p8 }
 0x30f   : > { %p1717_p11 = pnand %p1716_p10, %p1710_p4 }
 0x311   : > { %1720 = shalt.err (!%p1717_p11)
}
 0x312   : > { %1534 = dma.vmem_to_hbm [thread:$0]  (%p1929_p7), %s1259_s19, 16, %s2169_s12, %s1246_s17  }
 0x313 PF: > { %p1540_p13 = scmp.ge.s32.totalorder %s1803_s7, 2  ;;  %s1270_s27 = sand.u32 1, %s1767_s9  }
 0x314   : > { %s1271_s24 = scalar_lea.sflag [#allocation7], %s1270_s27 }
 0x315   : > { %p1537_p0 = pnand %p1540_p13, %p1937_p12 }
 0x317   : > { %1762 = dma.done.wait (!%p1537_p0), %s1271_s24, 16  }
 0x318   : > { %1764 = vsyncadd (!%p1537_p0), %s1271_s24, 4294967280  ;;  %s23_s7 = sadd.s32 1, %s1803_s7   ;;  %s2250_s25 = sld [smem:[#allocation13_spill]] }
 0x319   : > { %p20_p1 = scmp.ge.s32.totalorder %s23_s7, 6   ;;  %s2251_s14 = sld [smem:[#allocation9_spill]] }
 0x31a   : > { %s2252_s15 = sld [smem:[#allocation10_spill]]  ;;  %s2253_s6 = sld [smem:[#allocation11_spill]] }
 0x31b   : > { %s2254_s16 = sld [smem:[#allocation12_spill]]  ;;  %s2255_s9 = smov %s1771_s10 }
 0x31c   : > { %s2256_s10 = smov %s1775_s11  ;;  %s2257_s11 = smov %s1942_s29 }
 0x31d   : > { %s2258_s12 = smov %s1783_s13  ;;  %22 = sbr.rel (!%p20_p1) target bundleno = 10 (0xa), region = 144 }
 0x31e   : > { %s2259_s13 = smov %s2250_s25 }
 0x324   :  { %1275 = vsyncpa [#allocation7], 1 }
 0x325   :  { %1277 = vsyncpa [#allocation7 + $0x1], 1 }

</bundles_post_ra>
